<compile_context>
chip_gen: v7x
topology: tpu7x:2x2x1
jax: 0.10.0
libtpu: 0.0.40
codegen_flags: <defaults>
</compile_context>

<pallas_src>
import math

import jax
import jax.numpy as jnp
from jax.experimental import pallas as pl
from jax.experimental.pallas import tpu as pltpu


def _interp_matrix(out_size: int, in_size: int) -> jnp.ndarray:
    """Row-stochastic align_corners=True linear interpolation matrix [out, in]."""
    if out_size == 1 or in_size == 1:
        # Degenerate case: every output samples input index 0.
        if in_size > 1:
            return jnp.concatenate(
                [jnp.ones((out_size, 1), jnp.float32),
                 jnp.zeros((out_size, in_size - 1), jnp.float32)], axis=1)
        return jnp.ones((out_size, in_size), jnp.float32)
    idx = jnp.arange(out_size, dtype=jnp.float32)
    src = idx * (in_size - 1) / (out_size - 1)
    i0 = jnp.clip(jnp.floor(src).astype(jnp.int32), 0, in_size - 1)
    i1 = jnp.minimum(i0 + 1, in_size - 1)
    w1 = src - i0.astype(jnp.float32)
    w0 = 1.0 - w1
    oh0 = jax.nn.one_hot(i0, in_size, dtype=jnp.float32)
    oh1 = jax.nn.one_hot(i1, in_size, dtype=jnp.float32)
    return oh0 * w0[:, None] + oh1 * w1[:, None]


def _largest_divisor_leq(n: int, cap: int) -> int:
    cap = max(1, min(n, cap))
    for d in range(cap, 0, -1):
        if n % d == 0:
            return d
    return 1


def _round_down_mult8(v: int) -> int:
    return max(8, (v // 8) * 8)


def _resize_kernel(x_ref, wy_ref, wxt_ref, o_ref):
    # x_ref  : (b, H_in, W_in)   block of b consecutive (N*C) slices
    # wy_ref : (TH, H_in)        row-interp tile (scale pre-folded)
    # wxt_ref: (W_in, W_out)     column-interp matrix (transposed), grid-constant
    # o_ref  : (b, TH, W_out)
    wy = wy_ref[...]
    wxt = wxt_ref[...]
    cdt = wxt.dtype
    b = x_ref.shape[0]
    for i in range(b):  # static unroll; b is small (<= 8)
        # Row interpolation: (TH, H_in) @ (H_in, W_in) -> (TH, W_in), f32 accumulation.
        t = jnp.dot(wy, x_ref[i].astype(cdt), preferred_element_type=jnp.float32)
        # Column interpolation: (TH, W_in) @ (W_in, W_out) -> (TH, W_out).
        o = jnp.dot(t.astype(cdt), wxt, preferred_element_type=jnp.float32)
        o_ref[i] = o.astype(o_ref.dtype)


class ResizeTransform:
    """JAX/Pallas port of the PyTorch ResizeTransform (2-D bilinear path)."""

    def __init__(self, scale: float, dims: int, compute_in_bf16: bool = False):
        assert dims == 2, "Only dims=2 (bilinear) implemented in this kernel."
        # TODO(synk): dims=3 (trilinear) would need a third interpolation contraction.
        self.scale = float(scale)
        # Opt-in bf16 compute (f32 accumulation) for f32 inputs — mainly a v5e win.
        self.compute_in_bf16 = bool(compute_in_bf16)

    def __call__(self, x: jnp.ndarray) -> jnp.ndarray:
        if self.scale == 1.0:
            return x

        n, c, h_in, w_in = x.shape
        nc = n * c
        # recompute_scale_factor=True: out_size = floor(in_size * scale_factor)
        h_out = int(math.floor(h_in * self.scale))
        w_out = int(math.floor(w_in * self.scale))

        in_bytes = jnp.dtype(x.dtype).itemsize
        if x.dtype == jnp.bfloat16 or (self.compute_in_bf16 and x.dtype == jnp.float32):
            compute_dtype = jnp.bfloat16
        else:
            compute_dtype = jnp.float32
        cd_bytes = jnp.dtype(compute_dtype).itemsize

        # ---- tile choosers (no padding, no cliffs) ----
        # b: number of (N*C) slices per block. Always a divisor of nc (so the NCHW
        # reshape stays a free view); capped so the x block stays small and, when
        # possible, the nc grid axis has >=2 parallel blocks for v7x's two TCs.
        cap = max(1, (4 * 2 ** 20) // max(1, h_in * w_in * in_bytes))
        cap = min(cap, 8)
        if nc >= 2:
            cap = min(cap, max(1, nc // 2))
        b = _largest_divisor_leq(nc, cap)

        # th: output-row tile. Full extent for small H_out; otherwise a multiple of 8,
        # preferring exact divisors and falling back to a cdiv grid (clipped last tile).
        if h_out <= 512:
            th = h_out
        else:
            th = 256
            for t in (512, 256, 128, 64, 32, 16, 8):
                if h_out % t == 0:
                    th = t
                    break

        # VMEM-aware shrink: keep double-buffered blocks + intermediates under a
        # budget that is safe for v7x's 64 MiB physical VMEM.
        def _vmem_est(bb: int, tt: int) -> int:
            return (2 * bb * h_in * w_in * in_bytes       # x block (double buffered)
                    + 2 * tt * h_in * cd_bytes            # wy tile
                    + 2 * w_in * w_out * cd_bytes         # wxT (grid constant)
                    + 2 * bb * tt * w_out * in_bytes      # output block
                    + tt * (w_in + w_out) * 4)            # f32 intermediate t

        budget = 40 * 2 ** 20
        while _vmem_est(b, th) > budget and (b > 1 or th > 8):
            if b > 1:
                b = _largest_divisor_leq(nc, b - 1)
            elif th > 8:
                th = _round_down_mult8(th // 2)

        n_ht = pl.cdiv(h_out, th)
        wy_rows = n_ht * th

        # Interpolation matrices. The op is linear, so the scalar scale folds into Wy
        # identically for the pre-scale (scale<1) and post-scale (scale>1) branches.
        # (PyTorch rounds x*scale to the input dtype before interpolating when scale<1;
        #  bitwise parity in low-precision dtypes is not guaranteed, only numerical.)
        wy = _interp_matrix(h_out, h_in) * self.scale
        if wy_rows > h_out:
            wy = jnp.concatenate(
                [wy, jnp.zeros((wy_rows - h_out, h_in), jnp.float32)], axis=0)
        wy = wy.astype(compute_dtype)
        wxt = _interp_matrix(w_out, w_in).T.astype(compute_dtype)   # (W_in, W_out)

        # Free view: collapse leading dims; no HBM copy, no transpose.
        x3 = x.reshape(nc, h_in, w_in)

        flops = 2 * nc * (h_out * h_in * w_in + h_out * w_in * w_out)
        bytes_accessed = (nc * h_in * w_in * in_bytes
                          + nc * h_out * w_out * in_bytes
                          + (wy_rows * h_in + w_in * w_out) * cd_bytes)

        out3 = pl.pallas_call(
            _resize_kernel,
            out_shape=jax.ShapeDtypeStruct((nc, h_out, w_out), x.dtype),
            grid=(nc // b, n_ht),
            in_specs=[
                # x block: constant across the hi axis (stays resident per nc block).
                pl.BlockSpec((b, h_in, w_in), lambda bi, hi: (bi, 0, 0)),
                # Wy tile: constant across the nc axis.
                pl.BlockSpec((th, h_in), lambda bi, hi: (hi, 0)),
                # WxT: constant across the whole grid.
                pl.BlockSpec((w_in, w_out), lambda bi, hi: (0, 0)),
            ],
            out_specs=pl.BlockSpec((b, th, w_out), lambda bi, hi: (bi, hi, 0)),
            compiler_params=pltpu.CompilerParams(
                dimension_semantics=("parallel", "parallel"),
                vmem_limit_bytes=int(min(64 * 2 ** 20,
                                         max(32 * 2 ** 20, 2 * _vmem_est(b, th)))),
            ),
            cost_estimate=pl.CostEstimate(
                flops=flops, transcendentals=0, bytes_accessed=bytes_accessed),
        )(x3, wy, wxt)

        # Free view back to NCHW.
        return out3.reshape(n, c, h_out, w_out)


def _reference(x, scale):
    """Pure-JAX reference (same math, no Pallas) for a sanity check."""
    n, c, h_in, w_in = x.shape
    h_out = int(math.floor(h_in * scale))
    w_out = int(math.floor(w_in * scale))
    pre, post = (1.0, scale) if scale > 1.0 else (scale, 1.0)
    wy = _interp_matrix(h_out, h_in)
    wx = _interp_matrix(w_out, w_in)
    xf = x.astype(jnp.float32) * pre
    out = jnp.einsum("oi,ncij,pj->ncop", wy, xf, wx) * post
    return out.astype(x.dtype)


if __name__ == "__main__":
    key = jax.random.PRNGKey(0)
    x = jax.random.normal(key, (2, 4, 16, 16), dtype=jnp.float32)

    # Upscale branch (interpolate, then * scale).
    model_up = ResizeTransform(scale=2.0, dims=2)
    y_up = jax.block_until_ready(model_up(x))
    assert y_up.shape == (2, 4, 32, 32), y_up.shape
    y_up_ref = _reference(x, 2.0)
    assert jnp.max(jnp.abs(y_up - y_up_ref)) < 1e-4

    # Downscale branch (* scale, then interpolate).
    model_dn = ResizeTransform(scale=0.5, dims=2)
    y_dn = jax.block_until_ready(model_dn(x))
    assert y_dn.shape == (2, 4, 8, 8), y_dn.shape
    y_dn_ref = _reference(x, 0.5)
    assert jnp.max(jnp.abs(y_dn - y_dn_ref)) < 1e-4

    print("KERNEL_OK")
</pallas_src>

<mosaic_0001>
module attributes {stable_mosaic.version = 11 : i64} {
  func.func @_resize_kernel(%arg0: i32, %arg1: i32, %arg2: memref<4x16x16xf32, #tpu.memory_space<vmem>>, %arg3: memref<32x16xf32, #tpu.memory_space<vmem>>, %arg4: memref<16x32xf32, #tpu.memory_space<vmem>>, %arg5: memref<4x32x32xf32, #tpu.memory_space<vmem>>) attributes {dimension_semantics = [#tpu.dimension_semantics<parallel>, #tpu.dimension_semantics<parallel>], iteration_bounds = array<i64: 2, 1>, scalar_prefetch = 0 : i64, scratch_operands = 0 : i64, tpu.core_type = #tpu.core_type<tc>, window_params = [{transform_indices = @transform_0, window_bounds = array<i64: 4, 16, 16>}, {transform_indices = @transform_1, window_bounds = array<i64: 32, 16>}, {pipeline_mode = #tpu.pipeline_mode<synchronous>, transform_indices = @transform_2, window_bounds = array<i64: 16, 32>}, {transform_indices = @transform_3, window_bounds = array<i64: 4, 32, 32>}]} {
    %c0 = arith.constant 0 : index
    %c0_0 = arith.constant 0 : index
    %0 = vector.load %arg3[%c0, %c0_0] : memref<32x16xf32, #tpu.memory_space<vmem>>, vector<32x16xf32>
    %c0_1 = arith.constant 0 : index
    %c0_2 = arith.constant 0 : index
    %1 = vector.load %arg4[%c0_1, %c0_2] : memref<16x32xf32, #tpu.memory_space<vmem>>, vector<16x32xf32>
    %c0_3 = arith.constant 0 : index
    %c0_4 = arith.constant 0 : index
    %c0_5 = arith.constant 0 : index
    %2 = vector.load %arg2[%c0_3, %c0_4, %c0_5] : memref<4x16x16xf32, #tpu.memory_space<vmem>>, vector<1x16x16xf32>
    %3 = vector.shape_cast %2 : vector<1x16x16xf32> to vector<16x16xf32>
    %cst = arith.constant dense<0.000000e+00> : vector<32x16xf32>
    %4 = tpu.matmul %0, %3, %cst {dimension_numbers = #tpu.dot_dimension_numbers<[1], [0], [0], [1], [0, 0, 1, 1], [], []>} : vector<32x16xf32>, vector<16x16xf32>, vector<32x16xf32> -> vector<32x16xf32>
    %cst_6 = arith.constant dense<0.000000e+00> : vector<32x32xf32>
    %5 = tpu.matmul %4, %1, %cst_6 {dimension_numbers = #tpu.dot_dimension_numbers<[1], [0], [0], [1], [0, 0, 1, 1], [], []>} : vector<32x16xf32>, vector<16x32xf32>, vector<32x32xf32> -> vector<32x32xf32>
    %c0_7 = arith.constant 0 : index
    %c0_8 = arith.constant 0 : index
    %c0_9 = arith.constant 0 : index
    %6 = vector.load %arg5[%c0_7, %c0_8, %c0_9] : memref<4x32x32xf32, #tpu.memory_space<vmem>>, vector<1x32x32xf32>
    %7 = vector.shape_cast %6 : vector<1x32x32xf32> to vector<32x32xf32>
    %8 = vector.shape_cast %5 : vector<32x32xf32> to vector<1x32x32xf32>
    tpu.vector_store %arg5[%c0_7, %c0_8, %c0_9], %8 {strides = array<i32>} : memref<4x32x32xf32, #tpu.memory_space<vmem>>, vector<1x32x32xf32>,
    %c1 = arith.constant 1 : index
    %c0_10 = arith.constant 0 : index
    %c0_11 = arith.constant 0 : index
    %9 = vector.load %arg2[%c1, %c0_10, %c0_11] : memref<4x16x16xf32, #tpu.memory_space<vmem>>, vector<1x16x16xf32>
    %10 = vector.shape_cast %9 : vector<1x16x16xf32> to vector<16x16xf32>
    %cst_12 = arith.constant dense<0.000000e+00> : vector<32x16xf32>
    %11 = tpu.matmul %0, %10, %cst_12 {dimension_numbers = #tpu.dot_dimension_numbers<[1], [0], [0], [1], [0, 0, 1, 1], [], []>} : vector<32x16xf32>, vector<16x16xf32>, vector<32x16xf32> -> vector<32x16xf32>
    %cst_13 = arith.constant dense<0.000000e+00> : vector<32x32xf32>
    %12 = tpu.matmul %11, %1, %cst_13 {dimension_numbers = #tpu.dot_dimension_numbers<[1], [0], [0], [1], [0, 0, 1, 1], [], []>} : vector<32x16xf32>, vector<16x32xf32>, vector<32x32xf32> -> vector<32x32xf32>
    %c1_14 = arith.constant 1 : index
    %c0_15 = arith.constant 0 : index
    %c0_16 = arith.constant 0 : index
    %13 = vector.load %arg5[%c1_14, %c0_15, %c0_16] : memref<4x32x32xf32, #tpu.memory_space<vmem>>, vector<1x32x32xf32>
    %14 = vector.shape_cast %13 : vector<1x32x32xf32> to vector<32x32xf32>
    %15 = vector.shape_cast %12 : vector<32x32xf32> to vector<1x32x32xf32>
    tpu.vector_store %arg5[%c1_14, %c0_15, %c0_16], %15 {strides = array<i32>} : memref<4x32x32xf32, #tpu.memory_space<vmem>>, vector<1x32x32xf32>,
    %c2 = arith.constant 2 : index
    %c0_17 = arith.constant 0 : index
    %c0_18 = arith.constant 0 : index
    %16 = vector.load %arg2[%c2, %c0_17, %c0_18] : memref<4x16x16xf32, #tpu.memory_space<vmem>>, vector<1x16x16xf32>
    %17 = vector.shape_cast %16 : vector<1x16x16xf32> to vector<16x16xf32>
    %cst_19 = arith.constant dense<0.000000e+00> : vector<32x16xf32>
    %18 = tpu.matmul %0, %17, %cst_19 {dimension_numbers = #tpu.dot_dimension_numbers<[1], [0], [0], [1], [0, 0, 1, 1], [], []>} : vector<32x16xf32>, vector<16x16xf32>, vector<32x16xf32> -> vector<32x16xf32>
    %cst_20 = arith.constant dense<0.000000e+00> : vector<32x32xf32>
    %19 = tpu.matmul %18, %1, %cst_20 {dimension_numbers = #tpu.dot_dimension_numbers<[1], [0], [0], [1], [0, 0, 1, 1], [], []>} : vector<32x16xf32>, vector<16x32xf32>, vector<32x32xf32> -> vector<32x32xf32>
    %c2_21 = arith.constant 2 : index
    %c0_22 = arith.constant 0 : index
    %c0_23 = arith.constant 0 : index
    %20 = vector.load %arg5[%c2_21, %c0_22, %c0_23] : memref<4x32x32xf32, #tpu.memory_space<vmem>>, vector<1x32x32xf32>
    %21 = vector.shape_cast %20 : vector<1x32x32xf32> to vector<32x32xf32>
    %22 = vector.shape_cast %19 : vector<32x32xf32> to vector<1x32x32xf32>
    tpu.vector_store %arg5[%c2_21, %c0_22, %c0_23], %22 {strides = array<i32>} : memref<4x32x32xf32, #tpu.memory_space<vmem>>, vector<1x32x32xf32>,
    %c3 = arith.constant 3 : index
    %c0_24 = arith.constant 0 : index
    %c0_25 = arith.constant 0 : index
    %23 = vector.load %arg2[%c3, %c0_24, %c0_25] : memref<4x16x16xf32, #tpu.memory_space<vmem>>, vector<1x16x16xf32>
    %24 = vector.shape_cast %23 : vector<1x16x16xf32> to vector<16x16xf32>
    %cst_26 = arith.constant dense<0.000000e+00> : vector<32x16xf32>
    %25 = tpu.matmul %0, %24, %cst_26 {dimension_numbers = #tpu.dot_dimension_numbers<[1], [0], [0], [1], [0, 0, 1, 1], [], []>} : vector<32x16xf32>, vector<16x16xf32>, vector<32x16xf32> -> vector<32x16xf32>
    %cst_27 = arith.constant dense<0.000000e+00> : vector<32x32xf32>
    %26 = tpu.matmul %25, %1, %cst_27 {dimension_numbers = #tpu.dot_dimension_numbers<[1], [0], [0], [1], [0, 0, 1, 1], [], []>} : vector<32x16xf32>, vector<16x32xf32>, vector<32x32xf32> -> vector<32x32xf32>
    %c3_28 = arith.constant 3 : index
    %c0_29 = arith.constant 0 : index
    %c0_30 = arith.constant 0 : index
    %27 = vector.load %arg5[%c3_28, %c0_29, %c0_30] : memref<4x32x32xf32, #tpu.memory_space<vmem>>, vector<1x32x32xf32>
    %28 = vector.shape_cast %27 : vector<1x32x32xf32> to vector<32x32xf32>
    %29 = vector.shape_cast %26 : vector<32x32xf32> to vector<1x32x32xf32>
    tpu.vector_store %arg5[%c3_28, %c0_29, %c0_30], %29 {strides = array<i32>} : memref<4x32x32xf32, #tpu.memory_space<vmem>>, vector<1x32x32xf32>,
    return
  }
  func.func @transform_0(%arg0: i32, %arg1: i32) -> (i32, i32, i32) {
    %c0_i32 = arith.constant 0 : i32
    %c0_i32_0 = arith.constant 0 : i32
    %c0_i32_1 = arith.constant 0 : i32
    return %arg0, %c0_i32, %c0_i32_0 : i32, i32, i32
  }
  func.func @transform_1(%arg0: i32, %arg1: i32) -> (i32, i32) {
    %c0_i32 = arith.constant 0 : i32
    %c0_i32_0 = arith.constant 0 : i32
    return %arg1, %c0_i32 : i32, i32
  }
  func.func @transform_2(%arg0: i32, %arg1: i32) -> (i32, i32) {
    %c0_i32 = arith.constant 0 : i32
    %c0_i32_0 = arith.constant 0 : i32
    %c0_i32_1 = arith.constant 0 : i32
    return %c0_i32, %c0_i32_0 : i32, i32
  }
  func.func @transform_3(%arg0: i32, %arg1: i32) -> (i32, i32, i32) {
    %c0_i32 = arith.constant 0 : i32
    %c0_i32_0 = arith.constant 0 : i32
    return %arg0, %arg1, %c0_i32 : i32, i32, i32
  }
}

</mosaic_0001>

<bundles_post_ra>
// kernel: tpu_custom_call.1
= control target key start
LH: loop header
LB: loop body
LE: loop exit
PB: predicated region body
PF: predicated region fallthrough
CT: control target
= control target key end

     0   :  { %8 = vsyncpa [#allocation3], 0  ;;  %s1832_s0 = inlined_call_operand.hbm [shape: f32[8,16,16], index: 0, kind: input, shape index: {}]   ;;  %s1833_s1 = inlined_call_operand.vmem [shape: f32[32,16], index: 1, kind: input, shape index: {}]   ;;  %s1834_s2 = inlined_call_operand.vmem [shape: f32[16,32], index: 2, kind: input, shape index: {}]   ;;  %s1835_s3 = inlined_call_operand.hbm [shape: f32[8,32,32], index: 3, kind: output, shape index: {}]  }
   0x1   :  { %10 = vsyncpa [#allocation3 + $0x1], 0 }
   0x2   :  { %11 = vsyncpa [#allocation4], 0 }
   0x3   :  { %13 = vsyncpa [#allocation4 + $0x1], 0  ;;  %s1561_s12 = smov 0   ;;  %s1563_s13 = smov 0  }
   0x4   :  { %s1565_s14 = smov 0   ;;  %s1567_s15 = smov 0  }
   0x5   :  { %s1569_s16 = smov 0   ;;  %s1571_s17 = smov 0  }
   0x6 LB: > { %s1123_s18 = sadd.s32 4294967295, %s1533_s17   ;;  %s1124_s19 = sadd.s32 4294967294, %s1533_s17   ;;  %s1533_s17 = sphi %s1571_s17, %s19_s17   ;;  %s1529_s16 = sphi %s1569_s16, %s1850_s16   ;;  %s1525_s15 = sphi %s1567_s15, %s1849_s15   ;;  %s1521_s14 = sphi %s1565_s14, %s1848_s14   ;;  %s1517_s13 = sphi %s1563_s13, %s1847_s13   ;;  %s1513_s12 = sphi %s1561_s12, %s1846_s12  }
   0x7   : > { %s31_s20 = sadd.s32 1, %s1529_s16  ;;  %s38_s21 = sadd.s32 1, %s1521_s14 }
   0x8   : > { %p33_p0 = scmp.ge.s32.totalorder %s31_s20, 2  ;;  %p45_p1 = scmp.ne.s32.totalorder %s1521_s14, %s1517_s13 }
   0x9   : > { %p46_p2 = scmp.eq.s32.totalorder %s1533_s17, 0  ;;  %p51_p3 = scmp.ne.s32.totalorder %s1517_s13, %s1513_s12 }
   0xa   : > { %s1852_s20 = smov (%p33_p0, %s31_s20), 0  ;;  %p52_p5 = scmp.eq.s32.totalorder %s1123_s18, 0 }
   0xb   : > { %p1602_p4 = por %p46_p2, %p45_p1  ;;  %s35_s23 = ssub.s32 %s1529_s16, %s1852_s20 }
   0xc   : > { %p124_p6 = scmp.eq.s32.totalorder %s1123_s18, 1  ;;  %p36_p7 = scmp.eq.s32.totalorder %s35_s23, 0 }
   0xd   : > { %p1608_p8 = por %p52_p5, %p51_p3  ;;  %p130_p10 = scmp.eq.s32.totalorder %s1124_s19, 1 }
   0xe   : > { %p1612_p9 = por %p124_p6, %p45_p1  ;;  %p1367_p13 = scmp.lt.s32.totalorder %s1533_s17, 2 }
   0xf   : > { %s1617_s26 = scalar_select %p36_p7, %s1521_s14, %s38_s21  }
  0x10   : > { %s1839_s25 = scalar_select %p1612_p9, 1, 0 }
  0x11   : > { %p1619_p11 = por %p130_p10, %p51_p3  ;;  %s162_s28 = sand.u32 1, %s1521_s14  }
  0x12   : > { %s1128_s29 = sshll.u32 %s162_s28, 6  ;;  %s1192_s30 = sshll.u32 %s1529_s16, 10 }
  0x13   : > { %s1840_s27 = scalar_select %p1619_p11, 1, 0 }
  0x14   : > { %s1630_s6 = scalar_lea.hbm %s1832_s0, %s1192_s30  ;;  %s166_s7 = scalar_lea.vmem [#allocation2], %s1128_s29 }
  0x15   : > { %s174_s8 = sshll.u32 %s166_s7, 4  ;;  %p1636_p0 = pnand %p1367_p13, %p1602_p4  ;;  %s1632_s8 = int_to_ptr.vmem [resolvable:$true] %s174_s8 }
  0x16   : > { %s1641_s10 = scalar_lea.sflag [#allocation3], %s162_s28  ;;  %s1421_s11 = scalar_lea.hbm %s1630_s6, 1024 }
  0x17   : > { %p1422_p2 = scmp.ne.s32.totalorder %s1630_s6, %s1421_s11  ;;  %p1423_p3 = pneg %p1636_p0 }
  0x18   : > { %s1426_s21 = scalar_lea.hbm %s1832_s0, 2048  ;;  %p1427_p4 = scmp.lt.u32.totalorder %s1630_s6, %s1832_s0 }
  0x19   : > { %p1424_p5 = pnand %p1423_p3, %p1422_p2  ;;  %p1428_p7 = scmp.lt.u32.totalorder %s1426_s21, %s1421_s11 }
  0x1a   : > { %p1430_p13 = scmp.lt.u32.totalorder %s1421_s11, %s1630_s6 }
  0x1b   : > { %p1425_p6 = pneg %p1424_p5  ;;  %p1429_p10 = por %p1428_p7, %p1427_p4 }
  0x1d   : > { %p1431_p12 = por %p1430_p13, %p1429_p10 }
  0x1f   : > { %p1432_p1 = pnand %p1431_p12, %p1425_p6 }
  0x21   : > { %1435 = shalt.err (!%p1432_p1)
}
  0x22   : > { %s1436_s28 = scalar_lea.vmem %s1632_s8, 1024  ;;  %s1535_s29 = smov [#allocation2]  }
  0x23   : > { %p1437_p2 = scmp.ne.s32.totalorder %s1632_s8, %s1436_s28  ;;  %s1441_s30 = sshll.u32 %s1535_s29, 4  ;;  %s1442_s30 = int_to_ptr.vmem [resolvable:$false] %s1441_s30 }
  0x24   : > { %s1443_s4 = scalar_lea.vmem %s1442_s30, 2048  ;;  %p1444_p9 = scmp.lt.s32.totalorder %s1632_s8, %s1442_s30 }
  0x25   : > { %p1439_p5 = pnand %p1437_p2, %p1423_p3  ;;  %p1445_p4 = scmp.lt.s32.totalorder %s1443_s4, %s1436_s28 }
  0x27   : > { %p1440_p11 = pneg %p1439_p5  ;;  %p1446_p7 = por %p1445_p4, %p1444_p9 }
  0x29   : > { %p1447_p10 = pnand %p1446_p7, %p1440_p11 }
  0x2b   : > { %1450 = shalt.err (!%p1447_p10)
}
  0x2c   : > { %s1536_s5 = smov 128   ;;  %s1537_s7 = smov 8  }
  0x2d   : > { %1362 = dma.hbm_to_vmem [thread:$0]  (!%p1636_p0), %s1630_s6, 1024, %s1632_s8, %s1641_s10, %s1536_s5, %s1536_s5, %s1537_s7  }
  0x2e   : > { %p182_p12 = scmp.lt.s32.totalorder %s1533_s17, 3  ;;  %p1842_p1 = scmp.ge.s32.totalorder %s1533_s17, 1 }
  0x30   : > { %p183_p3 = pnand %p1842_p1, %p182_p12 }
  0x31   : > { %s1673_s11 = sand.u32 (!%p183_p3), 1, %s1517_s13  }
  0x32   : > { %186 = sbr.rel (%p183_p3) target bundleno = 535 (0x217), region = 32  ;;  %s1133_s18 = sshll.u32 (!%p183_p3), %s1673_s11, 6 }
  0x33   : > { %s189_s19 = scalar_lea.sflag (!%p183_p3), [#allocation3], %s1673_s11  ;;  %s1677_s21 = scalar_lea.vmem (!%p183_p3), [#allocation2], %s1133_s18 }
  0x39   : > { %1504 = dma.done.wait (%p1608_p8), %s189_s19, 1024  }
  0x3a   : > { %1506 = vsyncadd (%p1608_p8), %s189_s19, 4294966272  ;;  %vm237_vm0 = vcmask 130048   ;;  %v235_v0 = vld [vmem:[%s1677_s21] sm:$0xff]  ;;  %v236_v1 = vld [vmem:[%s1677_s21 + $0x8] sm:$0xff]  ;;  %s1134_s7 = sshll.u32 %s1673_s11, 7  ;;  %vm432_vm1 = vcmask 261120  }
  0x3b   : > { %v229_v2 = vld [vmem:[%s1833_s1] sm:$0xff]  ;;  %v1323_v3 = vpack.c.bf16 %v236_v1, %v235_v0  ;;  %v1143_v4 = vld [vmem:[%s1677_s21 + $0x10] sm:$0xff]  ;;  %v1144_v5 = vld [vmem:[%s1677_s21 + $0x18] sm:$0xff]  ;;  %s1742_s18 = scalar_lea.vmem [#allocation5], %s1134_s7  ;;  %s1194_s19 = sshll.u32 %s1525_s15, 11 }
  0x3c   : > { %1247 = vmatprep.mubr.msk.f32.mxu0 %vm237_vm0, %v229_v2  ;;  %v1331_v6 = vpack.c.bf16 %v1144_v5, %v1143_v4  ;;  %v1157_v7 = vld [vmem:[%s1677_s21 + $0x20] sm:$0xff]  ;;  %v1158_v8 = vld [vmem:[%s1677_s21 + $0x28] sm:$0xff]  ;;  %v231_v12 = vld [vmem:[%s1833_s1 + $0x10] sm:$0xff]  ;;  %s1777_s24 = scalar_lea.hbm %s1835_s3, %s1194_s19  ;;  %s1008_s15 = scalar_lea.sflag [#allocation4], %s1673_s11 }
  0x3d   : > { %1324 = vmatprep.subr.bf16.mxu0 %v1323_v3  ;;  %v230_v9 = vld [vmem:[%s1833_s1 + $0x8] sm:$0xff]  ;;  %v233_v10 = vld [vmem:[%s1834_s2] sm:$0xff]  ;;  %v1339_v13 = vpack.c.bf16 %v1158_v8, %v1157_v7  ;;  %v232_v15 = vld [vmem:[%s1833_s1 + $0x18] sm:$0xff]  ;;  %p1843_p9 = scmp.ne.s32.totalorder %s1839_s25, 0  ;;  %s1538_s10 = smov [#allocation5]  }
  0x3e   : > { %1326 = vmatpush3.bf16.msra.mxu0 %v1323_v3  ;;  %v234_v11 = vld [vmem:[%s1834_s2 + $0x8] sm:$0xff]  ;;  %v1171_v16 = vld [vmem:[%s1677_s21 + $0x30] sm:$0xff]  ;;  %v1172_v17 = vld [vmem:[%s1677_s21 + $0x38] sm:$0xff]  ;;  %s1024_s21 = sshll.u32 %s1742_s18, 4  ;;  %s1455_s22 = sshll.u32 %s1538_s10, 4  ;;  %s1779_s21 = int_to_ptr.vmem [resolvable:$true] %s1024_s21  ;;  %s1456_s22 = int_to_ptr.vmem [resolvable:$false] %s1455_s22 }
  0x3f   : > { %1332 = vmatprep.subr.bf16.mxu0 %v1331_v6  ;;  %v1327_v14 = vpack.c.bf16 %v234_v11, %v233_v10  ;;  %v1347_v18 = vpack.c.bf16 %v1172_v17, %v1171_v16  ;;  %s1451_s9 = scalar_lea.vmem %s1779_s21, 2048  ;;  %s1457_s23 = scalar_lea.vmem %s1456_s22, 4096 }
  0x40   : > { %p1452_p8 = scmp.ne.s32.totalorder %s1779_s21, %s1451_s9  ;;  %p1458_p6 = scmp.lt.s32.totalorder %s1779_s21, %s1456_s22 }
  0x41   : > { %1248 = vmatmul.mubr.msk.f32.vlgmr.msra.gmra.mrb[0].mxu0 %vm237_vm0, %v230_v9  ;;  %1328 = vmatprep.subr.bf16.mxu1 %v1327_v14  ;;  %p1459_p13 = scmp.lt.s32.totalorder %s1457_s23, %s1451_s9 }
  0x42   : > { %1334 = vmatpush3.bf16.msra.mxu0 %v1331_v6  ;;  %1250 = vmatprep.mubr.msk.f32.mxu0 %vm237_vm0, %v231_v12  ;;  %p1453_p11 = pnand %p1452_p8, %p1843_p9 }
  0x43   : > { %1340 = vmatprep.subr.bf16.mxu0 %v1339_v13  ;;  %1330 = vmatpush3.bf16.msra.mxu1 %v1327_v14  ;;  %p1460_p2 = por %p1459_p13, %p1458_p6 }
  0x44   : > { %1336 = vmatprep.subr.bf16.mxu1 %v1327_v14  ;;  %p1454_p0 = pneg %p1453_p11 }
  0x45   : > { %1251 = vmatmul.mubr.msk.f32.gmra.mrb[2].mxu0 %vm237_vm0, %v232_v15 }
  0x46   : > { %1267 = vmatprep.mubr.msk.f32.mxu0 %vm237_vm0, %v229_v2  ;;  %p1461_p5 = pnand %p1460_p2, %p1454_p0 }
  0x49   : > { %1268 = vmatmul.mubr.msk.f32.vlgmr.msra.gmra.mrb[4].mxu0 %vm237_vm0, %v230_v9 }
  0x4a   : > { %1342 = vmatpush3.bf16.msra.mxu0 %v1339_v13  ;;  %1270 = vmatprep.mubr.msk.f32.mxu0 %vm237_vm0, %v231_v12 }
  0x4b   : > { %1348 = vmatprep.subr.bf16.mxu0 %v1347_v18 }
  0x4d   : > { %1271 = vmatmul.mubr.msk.f32.gmra.mrb[6].mxu0 %vm237_vm0, %v232_v15 }
  0x4e   : > { %1287 = vmatprep.mubr.msk.f32.mxu0 %vm237_vm0, %v229_v2 }
  0x51   : > { %1288 = vmatmul.mubr.msk.f32.vlgmr.msra.gmra.mrb[8].mxu0 %vm237_vm0, %v230_v9 }
  0x52   : > { %1350 = vmatpush3.bf16.msra.mxu0 %v1347_v18  ;;  %1290 = vmatprep.mubr.msk.f32.mxu0 %vm237_vm0, %v231_v12 }
  0x55   : > { %1291 = vmatmul.mubr.msk.f32.gmra.mrb[10].mxu0 %vm237_vm0, %v232_v15 }
  0x56   : > { %1307 = vmatprep.mubr.msk.f32.mxu0 %vm237_vm0, %v229_v2 }
  0x59   : > { %1308 = vmatmul.mubr.msk.f32.vlgmr.msra.gmra.mrb[12].mxu0 %vm237_vm0, %v230_v9 }
  0x5a   : > { %1310 = vmatprep.mubr.msk.f32.mxu0 %vm237_vm0, %v231_v12 }
  0x5d   : > { %1311 = vmatmul.mubr.msk.f32.gmra.mrb[14].mxu0 %vm237_vm0, %v232_v15 }
 0x114   : > { %v1249_v19 = vpop.f32.mrb[0].mxu0 }
 0x115   : > { %v316_v20 = vpop.f32.mrb[1].mxu0 }
 0x116   : > { %1257 = vmatprep.mubr.msk.f32.mxu1 %vm237_vm0, %v316_v20 }
 0x117   : > { %1258 = vmatmul.mubr.msk.f32.vlgmr.msra.gmra.mrb[0].mxu1 %vm237_vm0, %v1249_v19 }
 0x118   : > { %v1252_v21 = vpop.f32.mrb[2].mxu0  ;;  %1338 = vmatpush3.bf16.msra.mxu1 %v1327_v14 }
 0x119   : > { %v326_v22 = vpop.f32.mrb[3].mxu0  ;;  %1344 = vmatprep.subr.bf16.mxu1 %v1327_v14 }
 0x11a   : > { %1260 = vmatprep.mubr.msk.f32.mxu1 %vm237_vm0, %v326_v22 }
 0x11b   : > { %1261 = vmatmul.mubr.msk.f32.gmra.mrb[2].mxu1 %vm237_vm0, %v1252_v21 }
 0x11c   : > { %v1269_v23 = vpop.f32.mrb[4].mxu0 }
 0x11d   : > { %v506_v24 = vpop.f32.mrb[5].mxu0 }
 0x11e   : > { %1277 = vmatprep.mubr.msk.f32.mxu1 %vm237_vm0, %v506_v24 }
 0x11f   : > { %1278 = vmatmul.mubr.msk.f32.vlgmr.msra.gmra.mrb[4].mxu1 %vm237_vm0, %v1269_v23 }
 0x120   : > { %v1272_v25 = vpop.f32.mrb[6].mxu0  ;;  %1346 = vmatpush3.bf16.msra.mxu1 %v1327_v14 }
 0x121   : > { %v516_v26 = vpop.f32.mrb[7].mxu0  ;;  %1352 = vmatprep.subr.bf16.mxu1 %v1327_v14 }
 0x122   : > { %1280 = vmatprep.mubr.msk.f32.mxu1 %vm237_vm0, %v516_v26 }
 0x123   : > { %1281 = vmatmul.mubr.msk.f32.gmra.mrb[6].mxu1 %vm237_vm0, %v1272_v25 }
 0x124   : > { %v1289_v27 = vpop.f32.mrb[8].mxu0 }
 0x125   : > { %v696_v28 = vpop.f32.mrb[9].mxu0 }
 0x126   : > { %1297 = vmatprep.mubr.msk.f32.mxu1 %vm237_vm0, %v696_v28 }
 0x127   : > { %1298 = vmatmul.mubr.msk.f32.vlgmr.msra.gmra.mrb[8].mxu1 %vm237_vm0, %v1289_v27 }
 0x128   : > { %v1292_v29 = vpop.f32.mrb[10].mxu0  ;;  %1354 = vmatpush3.bf16.msra.mxu1 %v1327_v14 }
 0x129   : > { %v706_v30 = vpop.f32.mrb[11].mxu0 }
 0x12a   : > { %1300 = vmatprep.mubr.msk.f32.mxu1 %vm237_vm0, %v706_v30 }
 0x12b   : > { %1301 = vmatmul.mubr.msk.f32.gmra.mrb[10].mxu1 %vm237_vm0, %v1292_v29 }
 0x12c   : > { %v1309_v31 = vpop.f32.mrb[12].mxu0 }
 0x12d   : > { %v886_v32 = vpop.f32.mrb[13].mxu0 }
 0x12e   : > { %1317 = vmatprep.mubr.msk.f32.mxu1 %vm237_vm0, %v886_v32 }
 0x12f   : > { %1318 = vmatmul.mubr.msk.f32.vlgmr.msra.gmra.mrb[12].mxu1 %vm237_vm0, %v1309_v31 }
 0x130   : > { %v1312_v33 = vpop.f32.mrb[14].mxu0 }
 0x131   : > { %v896_v34 = vpop.f32.mrb[15].mxu0 }
 0x132   : > { %1320 = vmatprep.mubr.msk.f32.mxu1 %vm237_vm0, %v896_v34 }
 0x133   : > { %1321 = vmatmul.mubr.msk.f32.gmra.mrb[14].mxu1 %vm237_vm0, %v1312_v33 }
 0x1ea   : > { %v1259_v35 = vpop.f32.mrb[0].mxu1 }
 0x1eb   : > { %434 = vst.msk [vmem:[%s1742_s18 + $0x8] sm:$0xff] %vm432_vm1, %v1259_v35  ;;  %v413_v36 = vpop.f32.mrb[1].mxu1 }
 0x1ec   : > { %433 = vst.msk [vmem:[%s1742_s18] sm:$0xff] %vm432_vm1, %v413_v36 }
 0x1ee   : > { %v1262_v37 = vpop.f32.mrb[2].mxu1 }
 0x1ef   : > { %436 = vst.msk [vmem:[%s1742_s18 + $0x18] sm:$0xff] %vm432_vm1, %v1262_v37  ;;  %v423_v38 = vpop.f32.mrb[3].mxu1 }
 0x1f0   : > { %435 = vst.msk [vmem:[%s1742_s18 + $0x10] sm:$0xff] %vm432_vm1, %v423_v38 }
 0x1f2   : > { %v1279_v39 = vpop.f32.mrb[4].mxu1 }
 0x1f3   : > { %1154 = vst.msk [vmem:[%s1742_s18 + $0x28] sm:$0xff] %vm432_vm1, %v1279_v39  ;;  %v603_v40 = vpop.f32.mrb[5].mxu1 }
 0x1f4   : > { %1153 = vst.msk [vmem:[%s1742_s18 + $0x20] sm:$0xff] %vm432_vm1, %v603_v40 }
 0x1f6   : > { %v1282_v41 = vpop.f32.mrb[6].mxu1 }
 0x1f7   : > { %1156 = vst.msk [vmem:[%s1742_s18 + $0x38] sm:$0xff] %vm432_vm1, %v1282_v41  ;;  %v613_v42 = vpop.f32.mrb[7].mxu1 }
 0x1f8   : > { %1155 = vst.msk [vmem:[%s1742_s18 + $0x30] sm:$0xff] %vm432_vm1, %v613_v42 }
 0x1fa   : > { %v1299_v43 = vpop.f32.mrb[8].mxu1 }
 0x1fb   : > { %1168 = vst.msk [vmem:[%s1742_s18 + $0x48] sm:$0xff] %vm432_vm1, %v1299_v43  ;;  %v793_v44 = vpop.f32.mrb[9].mxu1 }
 0x1fc   : > { %1167 = vst.msk [vmem:[%s1742_s18 + $0x40] sm:$0xff] %vm432_vm1, %v793_v44 }
 0x1fe   : > { %v1302_v45 = vpop.f32.mrb[10].mxu1 }
 0x1ff   : > { %1170 = vst.msk [vmem:[%s1742_s18 + $0x58] sm:$0xff] %vm432_vm1, %v1302_v45  ;;  %v803_v46 = vpop.f32.mrb[11].mxu1 }
 0x200   : > { %1169 = vst.msk [vmem:[%s1742_s18 + $0x50] sm:$0xff] %vm432_vm1, %v803_v46 }
 0x202   : > { %v1319_v47 = vpop.f32.mrb[12].mxu1 }
 0x203   : > { %1182 = vst.msk [vmem:[%s1742_s18 + $0x68] sm:$0xff] %vm432_vm1, %v1319_v47  ;;  %v983_v48 = vpop.f32.mrb[13].mxu1 }
 0x204   : > { %1181 = vst.msk [vmem:[%s1742_s18 + $0x60] sm:$0xff] %vm432_vm1, %v983_v48 }
 0x206   : > { %v1322_v49 = vpop.f32.mrb[14].mxu1 }
 0x207   : > { %1184 = vst.msk [vmem:[%s1742_s18 + $0x78] sm:$0xff] %vm432_vm1, %v1322_v49  ;;  %v993_v50 = vpop.f32.mrb[15].mxu1 }
 0x208   : > { %1183 = vst.msk [vmem:[%s1742_s18 + $0x70] sm:$0xff] %vm432_vm1, %v993_v50 }
 0x209   : > { %1464 = shalt.err (!%p1461_p5)
}
 0x20a   : > { %s1465_s28 = scalar_lea.hbm %s1777_s24, 2048  ;;  %s1469_s4 = scalar_lea.hbm %s1835_s3, 4096 }
 0x20b   : > { %p1466_p4 = scmp.ne.s32.totalorder %s1777_s24, %s1465_s28  ;;  %p1470_p12 = scmp.lt.u32.totalorder %s1777_s24, %s1835_s3 }
 0x20c   : > { %p1471_p1 = scmp.lt.u32.totalorder %s1469_s4, %s1465_s28  ;;  %p1473_p8 = scmp.lt.u32.totalorder %s1465_s28, %s1777_s24 }
 0x20d   : > { %p1467_p7 = pnand %p1466_p4, %p1843_p9 }
 0x20e   : > { %p1472_p3 = por %p1471_p1, %p1470_p12 }
 0x20f   : > { %p1468_p10 = pneg %p1467_p7 }
 0x210   : > { %p1474_p11 = por %p1473_p8, %p1472_p3 }
 0x212   : > { %p1475_p0 = pnand %p1474_p11, %p1468_p10 }
 0x214   : > { %1478 = shalt.err (!%p1475_p0)
}
 0x215   : > { %s1539_s18 = smov 128   ;;  %s1540_s19 = smov 8  }
 0x216   : > { %1357 = dma.vmem_to_hbm [thread:$0]  (%p1843_p9), %s1779_s21, 2048, %s1777_s24, %s1008_s15, %s1539_s18, %s1539_s18, %s1540_s19  }
 0x217 PF: > { %s1039_s6 = sand.u32 1, %s1513_s12   ;;  %p1844_p6 = scmp.ne.s32.totalorder %s1840_s27, 0 }
 0x218   : > { %p1845_p13 = scmp.ge.s32.totalorder %s1533_s17, 2  ;;  %s1040_s8 = scalar_lea.sflag [#allocation4], %s1039_s6 }
 0x21a   : > { %p1364_p2 = pnand %p1845_p13, %p1844_p6 }
 0x21c   : > { %1508 = dma.done.wait (!%p1364_p2), %s1040_s8, 2048  }
 0x21d   : > { %1510 = vsyncadd (!%p1364_p2), %s1040_s8, 4294965248  ;;  %s19_s17 = sadd.s32 1, %s1533_s17   ;;  %s1846_s12 = smov %s1517_s13 }
 0x21e   : > { %p16_p5 = scmp.ge.s32.totalorder %s19_s17, 4   ;;  %s1847_s13 = smov %s1521_s14 }
 0x21f   : > { %s1848_s14 = smov %s1617_s26  ;;  %s1849_s15 = smov %s1529_s16 }
 0x220   : > { %s1850_s16 = smov %s1852_s20  ;;  %18 = sbr.rel (!%p16_p5) target bundleno = 6 (0x6), region = 86 }
 0x227   :  { %1045 = vsyncpa [#allocation3], 1 }
 0x228   :  { %1047 = vsyncpa [#allocation3 + $0x1], 1 }
 0x229   :  { %1048 = vsyncpa [#allocation4], 1 }
 0x22a   :  { %1050 = vsyncpa [#allocation4 + $0x1], 1 }

</bundles_post_ra>
